<compile_context>
chip_gen: v7x
topology: tpu7x:2x2x1
jax: 0.10.0
libtpu: 0.0.40
codegen_flags: <defaults>
</compile_context>

<pallas_src>
import functools

import jax
import jax.numpy as jnp
from jax.experimental import pallas as pl
from jax.experimental.pallas import tpu as pltpu


def linear_kernel(x_ref, w_ref, b_ref, o_ref):
    # x_ref: (TB, Dp), w_ref: (Dp, Cp), b_ref: (1, Cp), o_ref: (TB, Cp)
    acc = jnp.dot(x_ref[...], w_ref[...], preferred_element_type=jnp.float32)
    o_ref[...] = (acc + b_ref[...].astype(jnp.float32)).astype(o_ref.dtype)


def _round_up(x: int, m: int) -> int:
    return ((x + m - 1) // m) * m


@functools.partial(jax.jit, static_argnames=("tb", "compute_dtype"))
def linear_classifier(x, w_t, b, *, tb=512, compute_dtype=None):
    """out = x @ w_t + b.

    x:   (B, D) float
    w_t: (D, C) float  (transposed nn.Linear weight)
    b:   (C,)   float
    """
    B, D = x.shape
    C = w_t.shape[1]
    out_dtype = x.dtype
    if compute_dtype is None:
        compute_dtype = x.dtype  # set to jnp.bfloat16 on v6e/v7x for ~2x on mem-bound heads

    # Pad contraction / class dims to MXU- and lane-friendly multiples of 128.
    d_pad = _round_up(max(D, 1), 128)
    c_pad = _round_up(max(C, 1), 128)

    # Batch tile: sublane-aligned, capped at the (padded) batch.
    tb = min(int(tb), _round_up(B, 8))
    b_pad = _round_up(B, tb)

    x_p = jnp.zeros((b_pad, d_pad), compute_dtype).at[:B, :D].set(x.astype(compute_dtype))
    w_p = jnp.zeros((d_pad, c_pad), compute_dtype).at[:D, :C].set(w_t.astype(compute_dtype))
    b_p = jnp.zeros((1, c_pad), jnp.float32).at[0, :C].set(b.astype(jnp.float32))

    grid = (b_pad // tb,)

    # VMEM budget: double-buffered x + out tiles, resident W + bias, headroom.
    itemsize_in = jnp.dtype(compute_dtype).itemsize
    itemsize_out = jnp.dtype(out_dtype).itemsize
    working_set = (
        2 * tb * d_pad * itemsize_in      # x tile, double-buffered
        + 2 * tb * c_pad * itemsize_out   # out tile, double-buffered
        + d_pad * c_pad * itemsize_in     # resident weight
        + c_pad * 4                       # resident bias
    )
    vmem_limit_bytes = int(min(max(working_set + (4 << 20), 32 << 20), 48 << 20))

    out_p = pl.pallas_call(
        linear_kernel,
        out_shape=jax.ShapeDtypeStruct((b_pad, c_pad), out_dtype),
        grid_spec=pltpu.PrefetchScalarGridSpec(
            num_scalar_prefetch=0,
            grid=grid,
            in_specs=[
                pl.BlockSpec((tb, d_pad), lambda i: (i, 0)),     # x: streamed per batch tile
                pl.BlockSpec((d_pad, c_pad), lambda i: (0, 0)),  # W: resident across the grid
                pl.BlockSpec((1, c_pad), lambda i: (0, 0)),      # b: resident across the grid
            ],
            out_specs=pl.BlockSpec((tb, c_pad), lambda i: (i, 0)),
        ),
        compiler_params=pltpu.CompilerParams(
            dimension_semantics=("parallel",),   # lets v7x shard batch tiles over 2 TCs
            vmem_limit_bytes=vmem_limit_bytes,
        ),
        cost_estimate=pl.CostEstimate(
            flops=2 * B * D * C,
            transcendentals=0,
            bytes_accessed=itemsize_in * (B * D + D * C) + itemsize_out * B * C + 4 * C,
        ),
    )(x_p, w_p, b_p)

    # Slice the zero padding back off.
    return out_p[:B, :C]


if __name__ == "__main__":
    # Small shapes consistent with the module: input_dim=32, num_classes=10.
    batch, input_dim, num_classes = 8, 32, 10

    key = jax.random.PRNGKey(0)
    kx, kw, kb = jax.random.split(key, 3)

    x = jax.random.normal(kx, (batch, input_dim), dtype=jnp.float32)

    # Deterministic init mimicking nn.Linear default: U(-1/sqrt(D), 1/sqrt(D)).
    bound = 1.0 / jnp.sqrt(jnp.float32(input_dim))
    w = jax.random.uniform(kw, (num_classes, input_dim),
                           minval=-bound, maxval=bound, dtype=jnp.float32)
    b = jax.random.uniform(kb, (num_classes,),
                           minval=-bound, maxval=bound, dtype=jnp.float32)

    out = linear_classifier(x, w.T, b)
    out = jax.block_until_ready(out)

    # Reference check against plain JAX (f32 path -> tight tolerance).
    ref = x @ w.T + b
    assert out.shape == (batch, num_classes)
    assert jnp.allclose(out, ref, atol=1e-5, rtol=1e-5)

    print("KERNEL_OK")
</pallas_src>

<mosaic_0001>
module attributes {stable_mosaic.version = 11 : i64} {
  func.func @linear_kernel(%arg0: i32, %arg1: memref<8x128xf32, #tpu.memory_space<vmem>>, %arg2: memref<128x128xf32, #tpu.memory_space<vmem>>, %arg3: memref<1x128xf32, #tpu.memory_space<vmem>>, %arg4: memref<8x128xf32, #tpu.memory_space<vmem>>) attributes {dimension_semantics = [#tpu.dimension_semantics<parallel>], iteration_bounds = array<i64: 1>, scalar_prefetch = 0 : i64, scratch_operands = 0 : i64, tpu.core_type = #tpu.core_type<tc>, window_params = [{transform_indices = @transform_0, window_bounds = array<i64: 8, 128>}, {pipeline_mode = #tpu.pipeline_mode<synchronous>, transform_indices = @transform_1, window_bounds = array<i64: 128, 128>}, {pipeline_mode = #tpu.pipeline_mode<synchronous>, transform_indices = @transform_2, window_bounds = array<i64: 1, 128>}, {transform_indices = @transform_3, window_bounds = array<i64: 8, 128>}]} {
    %c0 = arith.constant 0 : index
    %c0_0 = arith.constant 0 : index
    %0 = vector.load %arg1[%c0, %c0_0] : memref<8x128xf32, #tpu.memory_space<vmem>>, vector<8x128xf32>
    %c0_1 = arith.constant 0 : index
    %c0_2 = arith.constant 0 : index
    %1 = vector.load %arg2[%c0_1, %c0_2] : memref<128x128xf32, #tpu.memory_space<vmem>>, vector<128x128xf32>
    %cst = arith.constant dense<0.000000e+00> : vector<8x128xf32>
    %2 = tpu.matmul %0, %1, %cst {dimension_numbers = #tpu.dot_dimension_numbers<[1], [0], [0], [1], [0, 0, 1, 1], [], []>} : vector<8x128xf32>, vector<128x128xf32>, vector<8x128xf32> -> vector<8x128xf32>
    %c0_3 = arith.constant 0 : index
    %c0_4 = arith.constant 0 : index
    %3 = vector.load %arg3[%c0_3, %c0_4] : memref<1x128xf32, #tpu.memory_space<vmem>>, vector<1x128xf32>
    %4 = vector.broadcast %3 : vector<1x128xf32> to vector<8x128xf32>
    %5 = arith.addf %2, %4 : vector<8x128xf32>
    %c0_5 = arith.constant 0 : index
    %c0_6 = arith.constant 0 : index
    %6 = vector.load %arg4[%c0_5, %c0_6] : memref<8x128xf32, #tpu.memory_space<vmem>>, vector<8x128xf32>
    tpu.vector_store %arg4[%c0_5, %c0_6], %5 {strides = array<i32>} : memref<8x128xf32, #tpu.memory_space<vmem>>, vector<8x128xf32>,
    return
  }
  func.func @transform_0(%arg0: i32) -> (i32, i32) {
    %c0_i32 = arith.constant 0 : i32
    %c0_i32_0 = arith.constant 0 : i32
    return %arg0, %c0_i32 : i32, i32
  }
  func.func @transform_1(%arg0: i32) -> (i32, i32) {
    %c0_i32 = arith.constant 0 : i32
    %c0_i32_0 = arith.constant 0 : i32
    %c0_i32_1 = arith.constant 0 : i32
    return %c0_i32, %c0_i32_0 : i32, i32
  }
  func.func @transform_2(%arg0: i32) -> (i32, i32) {
    %c0_i32 = arith.constant 0 : i32
    %c0_i32_0 = arith.constant 0 : i32
    %c0_i32_1 = arith.constant 0 : i32
    return %c0_i32, %c0_i32_0 : i32, i32
  }
  func.func @transform_3(%arg0: i32) -> (i32, i32) {
    %c0_i32 = arith.constant 0 : i32
    %c0_i32_0 = arith.constant 0 : i32
    return %arg0, %c0_i32 : i32, i32
  }
}

</mosaic_0001>

<bundles_post_ra>
// kernel: linear_classifier.1
= control target key start
LH: loop header
LB: loop body
LE: loop exit
PB: predicated region body
PF: predicated region fallthrough
CT: control target
= control target key end

     0   :  { %v229_v3 = vmov 0.0|0.0   ;;  %vm230_vm0 = vmmov 0   ;;  %v231_v6 = vmov 0.0   ;;  %s319_s0 = inlined_call_operand.vmem [shape: f32[8,128], index: 0, kind: input, shape index: {}]   ;;  %s320_s1 = inlined_call_operand.vmem [shape: f32[128,128], index: 1, kind: input, shape index: {}]   ;;  %s321_s2 = inlined_call_operand.vmem [shape: f32[1,128], index: 2, kind: input, shape index: {}]   ;;  %s322_s3 = inlined_call_operand.hbm [shape: f32[8,128], index: 3, kind: output, shape index: {}]  }
   0x1   :  { %v16_v0 = vld [vmem:[%s320_s1] sm:$0xff]  ;;  %v17_v1 = vld [vmem:[%s320_s1 + $0x8] sm:$0xff]  ;;  %v18_v2 = vld [vmem:[%s320_s1 + $0x10] sm:$0xff]  ;;  %177 = vmatprep.subr.bf16.mxu0 %v229_v3  ;;  %174 = vmatprep.mubr.msk.f32.mxu0 %vm230_vm0, %v231_v6 }
   0x2   :  { %v178_v4 = vpack.c.bf16 %v17_v1, %v16_v0  ;;  %v19_v5 = vld [vmem:[%s320_s1 + $0x18] sm:$0xff]  ;;  %v20_v8 = vld [vmem:[%s320_s1 + $0x20] sm:$0xff]  ;;  %v21_v9 = vld [vmem:[%s320_s1 + $0x28] sm:$0xff] }
   0x3   :  { %v181_v7 = vpack.c.bf16 %v19_v5, %v18_v2 }
   0x4   :  { %179 = vmatpush3.bf16.msra.mxu0 %v178_v4 }
   0x5   :  { %180 = vmatprep.subr.bf16.mxu0 %v229_v3 }
   0x6   :  { %8 = vsyncpa [#allocation3], 0  ;;  %v184_v10 = vpack.c.bf16 %v21_v9, %v20_v8  ;;  %v22_v11 = vld [vmem:[%s320_s1 + $0x30] sm:$0xff]  ;;  %v23_v12 = vld [vmem:[%s320_s1 + $0x38] sm:$0xff]  ;;  %s232_s21 = smov [#allocation2]  }
   0x7   :  { %v187_v13 = vpack.c.bf16 %v23_v12, %v22_v11  ;;  %v24_v14 = vld [vmem:[%s320_s1 + $0x40] sm:$0xff]  ;;  %v25_v15 = vld [vmem:[%s320_s1 + $0x48] sm:$0xff]  ;;  %v26_v17 = vld [vmem:[%s320_s1 + $0x50] sm:$0xff]  ;;  %s116_s22 = sshll.u32 %s232_s21, 4  ;;  %s117_s22 = int_to_ptr.vmem [resolvable:$true] %s116_s22 }
   0x8   :  { %182 = vmatpush3.bf16.msra.mxu0 %v181_v7  ;;  %v190_v16 = vpack.c.bf16 %v25_v15, %v24_v14  ;;  %v27_v18 = vld [vmem:[%s320_s1 + $0x58] sm:$0xff]  ;;  %v28_v20 = vld [vmem:[%s320_s1 + $0x60] sm:$0xff]  ;;  %v29_v21 = vld [vmem:[%s320_s1 + $0x68] sm:$0xff]  ;;  %p210_p1 = scmp.lt.s32.totalorder %s117_s22, %s117_s22 }
   0x9   :  { %183 = vmatprep.subr.bf16.mxu0 %v229_v3  ;;  %v193_v19 = vpack.c.bf16 %v27_v18, %v26_v17  ;;  %v196_v22 = vpack.c.bf16 %v29_v21, %v28_v20  ;;  %v30_v23 = vld [vmem:[%s320_s1 + $0x70] sm:$0xff]  ;;  %v31_v24 = vld [vmem:[%s320_s1 + $0x78] sm:$0xff]  ;;  %v15_v26 = vld [vmem:[%s319_s0] sm:$0xff]  ;;  %s205_s1 = scalar_lea.vmem %s117_s22, 128 }
   0xa   :  { %v199_v25 = vpack.c.bf16 %v31_v24, %v30_v23  ;;  %v124_v27 = vld [vmem:[%s321_s2] ss:$0 sm:$0xff]  ;;  %p206_p0 = scmp.ne.s32.totalorder %s117_s22, %s205_s1  ;;  %p211_p2 = scmp.lt.s32.totalorder %s205_s1, %s205_s1 }
   0xc   :  { %185 = vmatpush3.bf16.msra.mxu0 %v184_v10  ;;  %p212_p3 = por %p211_p2, %p210_p1 }
   0xd   :  { %186 = vmatprep.subr.bf16.mxu0 %v229_v3 }
   0xe   :  { %p213_p4 = pnand %p212_p3, %p206_p0 }
  0x10   :  { %188 = vmatpush3.bf16.msra.mxu0 %v187_v13 }
  0x11   :  { %189 = vmatprep.subr.bf16.mxu0 %v229_v3 }
  0x14   :  { %191 = vmatpush3.bf16.msra.mxu0 %v190_v16 }
  0x15   :  { %192 = vmatprep.subr.bf16.mxu0 %v229_v3 }
  0x18   :  { %194 = vmatpush3.bf16.msra.mxu0 %v193_v19 }
  0x19   :  { %195 = vmatprep.subr.bf16.mxu0 %v229_v3 }
  0x1c   :  { %197 = vmatpush3.bf16.msra.mxu0 %v196_v22 }
  0x1d   :  { %198 = vmatprep.subr.bf16.mxu0 %v229_v3 }
  0x20   :  { %200 = vmatpush3.bf16.msra.mxu0 %v199_v25 }
  0x23   :  { %175 = vmatmul.mubr.f32.vlgmr.msra.gmra.mrb[0].mxu0 %v15_v26 }
  0xf6   :  { %v105_v28 = vpop.f32.mrb[0].mxu0 }
  0xf7   :  { %v106_v29 = vadd.f32 %v124_v27, %v105_v28  ;;  %v176_v30 = vpop.f32.mrb[1].mxu0 }
  0xf9   :  { %109 = vst [vmem:[#allocation2] sm:$0xff] %v106_v29 }
  0xfa   :  { %216 = shalt.err (!%p213_p4)
}
  0xfb   :  { %s217_s24 = scalar_lea.hbm %s322_s3, 128 }
  0xfc   :  { %p218_p5 = scmp.ne.s32.totalorder %s322_s3, %s217_s24  ;;  %p221_p6 = scmp.lt.u32.totalorder %s217_s24, %s322_s3 }
  0xfe   :  { %p223_p7 = pnand %p221_p6, %p218_p5 }
 0x100   :  { %226 = shalt.err (!%p223_p7)
}
 0x101   :  { %119 = dma.vmem_to_hbm [thread:$0]  %s117_s22, 128, %s322_s3, [#allocation3]  }
 0x102   :  { %227 = dma.done.wait [#allocation3], 128  }
 0x103   :  { %228 = vsyncadd [#allocation3], 4294967168 }
 0x104   :  { %123 = vsyncpa [#allocation3], 1 }

</bundles_post_ra>
